<compile_context>
chip_gen: v7x
topology: tpu7x:2x2x1
jax: 0.10.0
libtpu: 0.0.40
codegen_flags: <defaults>
</compile_context>

<pallas_src>
import functools

import jax
import jax.numpy as jnp
from jax.experimental import pallas as pl
from jax.experimental.pallas import tpu as pltpu


def _round_up(n, m):
    return ((n + m - 1) // m) * m


def _spread_mlp_kernel(x_ref,
                       w1_ref, b1_ref,
                       w2_ref, b2_ref,
                       w3_ref, b3_ref,
                       wh_ref, bh_ref,
                       out_ref):
    # x / weights are bf16; accumulate in f32 on the MXU, bias+ReLU in f32 (VPU),
    # cast back to bf16 only to feed the next matmul.
    h = jnp.dot(x_ref[...], w1_ref[...], preferred_element_type=jnp.float32) + b1_ref[...]
    h = jnp.maximum(h, 0.0).astype(jnp.bfloat16)

    h = jnp.dot(h, w2_ref[...], preferred_element_type=jnp.float32) + b2_ref[...]
    h = jnp.maximum(h, 0.0).astype(jnp.bfloat16)

    h = jnp.dot(h, w3_ref[...], preferred_element_type=jnp.float32) + b3_ref[...]
    h = jnp.maximum(h, 0.0).astype(jnp.bfloat16)

    # Fused policy|value head, lane-dense (width padded to 128) -> unmasked stores.
    out_ref[...] = (jnp.dot(h, wh_ref[...], preferred_element_type=jnp.float32)
                    + bh_ref[...]).astype(out_ref.dtype)


@functools.partial(jax.jit)
def spread_mlp_forward(x, params):
    """Returns (policy_out [B, num_outputs], value_out [B])."""
    (w1, b1, w2, b2, w3, b3, wp, bp, wv, bv) = params
    batch, obs_dim = x.shape
    hidden = w1.shape[1]
    num_outputs = wp.shape[1]

    # Fuse the two heads and pad the head width to a full 128-lane slab so every
    # output store is lane-dense (no vst.msk on widths 8 / 1).
    head_w = num_outputs + 1
    head_pad = _round_up(head_w, 128)
    wh = jnp.concatenate([wp, wv], axis=1)
    wh = jnp.pad(wh, ((0, 0), (0, head_pad - head_w)))
    bh = jnp.concatenate([bp, bv], axis=1)
    bh = jnp.pad(bh, ((0, 0), (0, head_pad - head_w)))

    # Batch tile: multiples of 256 rows fill the 256-wide MXU on v6e/v7x; fall
    # back to a single small (multiple-of-8) tile for tiny inference batches.
    tb = min(256, _round_up(batch, 8))
    b_pad = _round_up(batch, tb)
    if b_pad != batch:
        x = jnp.pad(x, ((0, b_pad - batch), (0, 0)))

    # bf16 operands (cast once here, not per grid step); biases stay f32.
    x_bf = x.astype(jnp.bfloat16)
    w1_bf = w1.astype(jnp.bfloat16)
    w2_bf = w2.astype(jnp.bfloat16)
    w3_bf = w3.astype(jnp.bfloat16)
    wh_bf = wh.astype(jnp.bfloat16)

    grid = (b_pad // tb,)

    x_spec = pl.BlockSpec((tb, obs_dim), lambda i: (i, 0))
    out_spec = pl.BlockSpec((tb, head_pad), lambda i: (i, 0))

    def resident(shape):
        # Weights/biases: same block for every grid step -> stay VMEM-resident.
        return pl.BlockSpec(shape, lambda i: (0, 0))

    in_specs = [
        x_spec,
        resident((obs_dim, hidden)), resident((1, hidden)),
        resident((hidden, hidden)), resident((1, hidden)),
        resident((hidden, hidden)), resident((1, hidden)),
        resident((hidden, head_pad)), resident((1, head_pad)),
    ]

    flops = 2 * b_pad * (obs_dim * hidden + 2 * hidden * hidden + hidden * head_pad)
    bytes_accessed = (
        x_bf.size * 2
        + (w1_bf.size + w2_bf.size + w3_bf.size + wh_bf.size) * 2
        + (b1.size + b2.size + b3.size + bh.size) * 4
        + b_pad * head_pad * 4
    )

    # VMEM budget: resident bf16 weights ~100 KB + double-buffered (tb,16) bf16
    # input and (tb,128) f32 output tiles -> well under the 32 MiB scoped default
    # on every chip (v5e/v6e/v7x), so no vmem_limit_bytes override needed.
    out = pl.pallas_call(
        _spread_mlp_kernel,
        out_shape=jax.ShapeDtypeStruct((b_pad, head_pad), jnp.float32),
        grid=grid,
        in_specs=in_specs,
        out_specs=out_spec,
        compiler_params=pltpu.CompilerParams(
            dimension_semantics=("parallel",)),
        cost_estimate=pl.CostEstimate(
            flops=flops, transcendentals=0, bytes_accessed=bytes_accessed),
    )(x_bf, w1_bf, b1, w2_bf, b2, w3_bf, b3, wh_bf, bh)

    policy_out = out[:batch, :num_outputs]
    # value_function() does torch.reshape(value_out, [-1]); column slice is 1-D.
    value_out = out[:batch, num_outputs]
    return policy_out, value_out


def init_params(key, obs_dim, hidden, num_outputs):
    """Deterministic synthetic init (shapes match nn.Linear layers, stored (in,out))."""
    ks = jax.random.split(key, 10)

    def linear(kw, kb, fan_in, fan_out):
        lim = 1.0 / jnp.sqrt(jnp.float32(fan_in))
        w = jax.random.uniform(kw, (fan_in, fan_out), jnp.float32, -lim, lim)
        b = jax.random.uniform(kb, (1, fan_out), jnp.float32, -lim, lim)
        return w, b

    w1, b1 = linear(ks[0], ks[1], obs_dim, hidden)
    w2, b2 = linear(ks[2], ks[3], hidden, hidden)
    w3, b3 = linear(ks[4], ks[5], hidden, hidden)
    wp, bp = linear(ks[6], ks[7], hidden, num_outputs)
    wv, bv = linear(ks[8], ks[9], hidden, 1)
    return (w1, b1, w2, b2, w3, b3, wp, bp, wv, bv)


def reference_forward(x, params):
    """Pure-JAX reference with the same bf16-operand / f32-accumulate recipe."""
    (w1, b1, w2, b2, w3, b3, wp, bp, wv, bv) = params

    def mm(a, w):
        return jnp.dot(a.astype(jnp.bfloat16), w.astype(jnp.bfloat16),
                       preferred_element_type=jnp.float32)

    h = jnp.maximum(mm(x, w1) + b1, 0.0)
    h = jnp.maximum(mm(h, w2) + b2, 0.0)
    h = jnp.maximum(mm(h, w3) + b3, 0.0)
    return mm(h, wp) + bp, (mm(h, wv) + bv).reshape(-1)


if __name__ == "__main__":
    batch = 8
    obs_dim = 16          # obs_space.shape[0]
    hidden = 128
    num_outputs = 8       # action logits

    key = jax.random.PRNGKey(0)
    k_x, k_p = jax.random.split(key)
    x = jax.random.normal(k_x, (batch, obs_dim), jnp.float32)
    params = init_params(k_p, obs_dim, hidden, num_outputs)

    policy_out, value_out = spread_mlp_forward(x, params)
    jax.block_until_ready((policy_out, value_out))

    # sanity check against a pure-JAX reference (same bf16/f32 recipe)
    ref_p, ref_v = reference_forward(x, params)
    assert policy_out.shape == (batch, num_outputs)
    assert value_out.shape == (batch,)
    assert jnp.allclose(policy_out, ref_p, atol=1e-3, rtol=1e-3)
    assert jnp.allclose(value_out, ref_v, atol=1e-3, rtol=1e-3)

    print("KERNEL_OK")
</pallas_src>

<mosaic_0001>
module attributes {stable_mosaic.version = 11 : i64} {
  func.func @_spread_mlp_kernel(%arg0: i32, %arg1: memref<8x16xbf16, #tpu.memory_space<vmem>>, %arg2: memref<16x128xbf16, #tpu.memory_space<vmem>>, %arg3: memref<1x128xf32, #tpu.memory_space<vmem>>, %arg4: memref<128x128xbf16, #tpu.memory_space<vmem>>, %arg5: memref<1x128xf32, #tpu.memory_space<vmem>>, %arg6: memref<128x128xbf16, #tpu.memory_space<vmem>>, %arg7: memref<1x128xf32, #tpu.memory_space<vmem>>, %arg8: memref<128x128xbf16, #tpu.memory_space<vmem>>, %arg9: memref<1x128xf32, #tpu.memory_space<vmem>>, %arg10: memref<8x128xf32, #tpu.memory_space<vmem>>) attributes {dimension_semantics = [#tpu.dimension_semantics<parallel>], iteration_bounds = array<i64: 1>, scalar_prefetch = 0 : i64, scratch_operands = 0 : i64, tpu.core_type = #tpu.core_type<tc>, window_params = [{transform_indices = @transform_0, window_bounds = array<i64: 8, 16>}, {pipeline_mode = #tpu.pipeline_mode<synchronous>, transform_indices = @transform_1, window_bounds = array<i64: 16, 128>}, {pipeline_mode = #tpu.pipeline_mode<synchronous>, transform_indices = @transform_2, window_bounds = array<i64: 1, 128>}, {pipeline_mode = #tpu.pipeline_mode<synchronous>, transform_indices = @transform_3, window_bounds = array<i64: 128, 128>}, {pipeline_mode = #tpu.pipeline_mode<synchronous>, transform_indices = @transform_4, window_bounds = array<i64: 1, 128>}, {pipeline_mode = #tpu.pipeline_mode<synchronous>, transform_indices = @transform_5, window_bounds = array<i64: 128, 128>}, {pipeline_mode = #tpu.pipeline_mode<synchronous>, transform_indices = @transform_6, window_bounds = array<i64: 1, 128>}, {pipeline_mode = #tpu.pipeline_mode<synchronous>, transform_indices = @transform_7, window_bounds = array<i64: 128, 128>}, {pipeline_mode = #tpu.pipeline_mode<synchronous>, transform_indices = @transform_8, window_bounds = array<i64: 1, 128>}, {transform_indices = @transform_9, window_bounds = array<i64: 8, 128>}]} {
    %c0 = arith.constant 0 : index
    %c0_0 = arith.constant 0 : index
    %0 = vector.load %arg1[%c0, %c0_0] : memref<8x16xbf16, #tpu.memory_space<vmem>>, vector<8x16xbf16>
    %c0_1 = arith.constant 0 : index
    %c0_2 = arith.constant 0 : index
    %1 = vector.load %arg2[%c0_1, %c0_2] : memref<16x128xbf16, #tpu.memory_space<vmem>>, vector<16x128xbf16>
    %cst = arith.constant dense<0.000000e+00> : vector<8x128xf32>
    %2 = tpu.matmul %0, %1, %cst {dimension_numbers = #tpu.dot_dimension_numbers<[1], [0], [0], [1], [0, 0, 1, 1], [], []>} : vector<8x16xbf16>, vector<16x128xbf16>, vector<8x128xf32> -> vector<8x128xf32>
    %c0_3 = arith.constant 0 : index
    %c0_4 = arith.constant 0 : index
    %3 = vector.load %arg3[%c0_3, %c0_4] : memref<1x128xf32, #tpu.memory_space<vmem>>, vector<1x128xf32>
    %4 = vector.broadcast %3 : vector<1x128xf32> to vector<8x128xf32>
    %5 = arith.addf %2, %4 : vector<8x128xf32>
    %cst_5 = arith.constant 0.000000e+00 : f32
    %6 = vector.broadcast %cst_5 : f32 to vector<8x128xf32>
    %7 = arith.maximumf %5, %6 : vector<8x128xf32>
    %8 = arith.truncf %7 : vector<8x128xf32> to vector<8x128xbf16>
    %c0_6 = arith.constant 0 : index
    %c0_7 = arith.constant 0 : index
    %9 = vector.load %arg4[%c0_6, %c0_7] : memref<128x128xbf16, #tpu.memory_space<vmem>>, vector<128x128xbf16>
    %cst_8 = arith.constant dense<0.000000e+00> : vector<8x128xf32>
    %10 = tpu.matmul %8, %9, %cst_8 {dimension_numbers = #tpu.dot_dimension_numbers<[1], [0], [0], [1], [0, 0, 1, 1], [], []>} : vector<8x128xbf16>, vector<128x128xbf16>, vector<8x128xf32> -> vector<8x128xf32>
    %c0_9 = arith.constant 0 : index
    %c0_10 = arith.constant 0 : index
    %11 = vector.load %arg5[%c0_9, %c0_10] : memref<1x128xf32, #tpu.memory_space<vmem>>, vector<1x128xf32>
    %12 = vector.broadcast %11 : vector<1x128xf32> to vector<8x128xf32>
    %13 = arith.addf %10, %12 : vector<8x128xf32>
    %cst_11 = arith.constant 0.000000e+00 : f32
    %14 = vector.broadcast %cst_11 : f32 to vector<8x128xf32>
    %15 = arith.maximumf %13, %14 : vector<8x128xf32>
    %16 = arith.truncf %15 : vector<8x128xf32> to vector<8x128xbf16>
    %c0_12 = arith.constant 0 : index
    %c0_13 = arith.constant 0 : index
    %17 = vector.load %arg6[%c0_12, %c0_13] : memref<128x128xbf16, #tpu.memory_space<vmem>>, vector<128x128xbf16>
    %cst_14 = arith.constant dense<0.000000e+00> : vector<8x128xf32>
    %18 = tpu.matmul %16, %17, %cst_14 {dimension_numbers = #tpu.dot_dimension_numbers<[1], [0], [0], [1], [0, 0, 1, 1], [], []>} : vector<8x128xbf16>, vector<128x128xbf16>, vector<8x128xf32> -> vector<8x128xf32>
    %c0_15 = arith.constant 0 : index
    %c0_16 = arith.constant 0 : index
    %19 = vector.load %arg7[%c0_15, %c0_16] : memref<1x128xf32, #tpu.memory_space<vmem>>, vector<1x128xf32>
    %20 = vector.broadcast %19 : vector<1x128xf32> to vector<8x128xf32>
    %21 = arith.addf %18, %20 : vector<8x128xf32>
    %cst_17 = arith.constant 0.000000e+00 : f32
    %22 = vector.broadcast %cst_17 : f32 to vector<8x128xf32>
    %23 = arith.maximumf %21, %22 : vector<8x128xf32>
    %24 = arith.truncf %23 : vector<8x128xf32> to vector<8x128xbf16>
    %c0_18 = arith.constant 0 : index
    %c0_19 = arith.constant 0 : index
    %25 = vector.load %arg8[%c0_18, %c0_19] : memref<128x128xbf16, #tpu.memory_space<vmem>>, vector<128x128xbf16>
    %cst_20 = arith.constant dense<0.000000e+00> : vector<8x128xf32>
    %26 = tpu.matmul %24, %25, %cst_20 {dimension_numbers = #tpu.dot_dimension_numbers<[1], [0], [0], [1], [0, 0, 1, 1], [], []>} : vector<8x128xbf16>, vector<128x128xbf16>, vector<8x128xf32> -> vector<8x128xf32>
    %c0_21 = arith.constant 0 : index
    %c0_22 = arith.constant 0 : index
    %27 = vector.load %arg9[%c0_21, %c0_22] : memref<1x128xf32, #tpu.memory_space<vmem>>, vector<1x128xf32>
    %28 = vector.broadcast %27 : vector<1x128xf32> to vector<8x128xf32>
    %29 = arith.addf %26, %28 : vector<8x128xf32>
    %c0_23 = arith.constant 0 : index
    %c0_24 = arith.constant 0 : index
    %30 = vector.load %arg10[%c0_23, %c0_24] : memref<8x128xf32, #tpu.memory_space<vmem>>, vector<8x128xf32>
    tpu.vector_store %arg10[%c0_23, %c0_24], %29 {strides = array<i32>} : memref<8x128xf32, #tpu.memory_space<vmem>>, vector<8x128xf32>,
    return
  }
  func.func @transform_0(%arg0: i32) -> (i32, i32) {
    %c0_i32 = arith.constant 0 : i32
    %c0_i32_0 = arith.constant 0 : i32
    return %arg0, %c0_i32 : i32, i32
  }
  func.func @transform_1(%arg0: i32) -> (i32, i32) {
    %c0_i32 = arith.constant 0 : i32
    %c0_i32_0 = arith.constant 0 : i32
    %c0_i32_1 = arith.constant 0 : i32
    return %c0_i32, %c0_i32_0 : i32, i32
  }
  func.func @transform_2(%arg0: i32) -> (i32, i32) {
    %c0_i32 = arith.constant 0 : i32
    %c0_i32_0 = arith.constant 0 : i32
    %c0_i32_1 = arith.constant 0 : i32
    return %c0_i32, %c0_i32_0 : i32, i32
  }
  func.func @transform_3(%arg0: i32) -> (i32, i32) {
    %c0_i32 = arith.constant 0 : i32
    %c0_i32_0 = arith.constant 0 : i32
    %c0_i32_1 = arith.constant 0 : i32
    return %c0_i32, %c0_i32_0 : i32, i32
  }
  func.func @transform_4(%arg0: i32) -> (i32, i32) {
    %c0_i32 = arith.constant 0 : i32
    %c0_i32_0 = arith.constant 0 : i32
    %c0_i32_1 = arith.constant 0 : i32
    return %c0_i32, %c0_i32_0 : i32, i32
  }
  func.func @transform_5(%arg0: i32) -> (i32, i32) {
    %c0_i32 = arith.constant 0 : i32
    %c0_i32_0 = arith.constant 0 : i32
    %c0_i32_1 = arith.constant 0 : i32
    return %c0_i32, %c0_i32_0 : i32, i32
  }
  func.func @transform_6(%arg0: i32) -> (i32, i32) {
    %c0_i32 = arith.constant 0 : i32
    %c0_i32_0 = arith.constant 0 : i32
    %c0_i32_1 = arith.constant 0 : i32
    return %c0_i32, %c0_i32_0 : i32, i32
  }
  func.func @transform_7(%arg0: i32) -> (i32, i32) {
    %c0_i32 = arith.constant 0 : i32
    %c0_i32_0 = arith.constant 0 : i32
    %c0_i32_1 = arith.constant 0 : i32
    return %c0_i32, %c0_i32_0 : i32, i32
  }
  func.func @transform_8(%arg0: i32) -> (i32, i32) {
    %c0_i32 = arith.constant 0 : i32
    %c0_i32_0 = arith.constant 0 : i32
    %c0_i32_1 = arith.constant 0 : i32
    return %c0_i32, %c0_i32_0 : i32, i32
  }
  func.func @transform_9(%arg0: i32) -> (i32, i32) {
    %c0_i32 = arith.constant 0 : i32
    %c0_i32_0 = arith.constant 0 : i32
    return %arg0, %c0_i32 : i32, i32
  }
}

</mosaic_0001>

<bundles_post_ra>
// kernel: spread_mlp_forward.1
= control target key start
LH: loop header
LB: loop body
LE: loop exit
PB: predicated region body
PF: predicated region fallthrough
CT: control target
= control target key end

     0   :  { %v589_v0 = vmov 0.0   ;;  %vm590_vm0 = vmmov 0   ;;  %vm49_vm1 = vcmask 130048   ;;  %s767_s1 = inlined_call_operand.vmem [shape: bf16[16,128], index: 1, kind: input, shape index: {}]   ;;  %s768_s0 = inlined_call_operand.vmem [shape: bf16[8,16], index: 0, kind: input, shape index: {}]   ;;  %s769_s3 = inlined_call_operand.vmem [shape: bf16[128,128], index: 3, kind: input, shape index: {}]   ;;  %s770_s5 = inlined_call_operand.vmem [shape: bf16[128,128], index: 5, kind: input, shape index: {}]   ;;  %s771_s2 = inlined_call_operand.vmem [shape: f32[1,128], index: 2, kind: input, shape index: {}]   ;;  %s772_s7 = inlined_call_operand.vmem [shape: bf16[128,128], index: 7, kind: input, shape index: {}]   ;;  %s773_s4 = inlined_call_operand.vmem [shape: f32[1,128], index: 4, kind: input, shape index: {}]   ;;  %s774_s6 = inlined_call_operand.vmem [shape: f32[1,128], index: 6, kind: input, shape index: {}]   ;;  %s775_s8 = inlined_call_operand.vmem [shape: f32[1,128], index: 8, kind: input, shape index: {}]   ;;  %s776_s9 = inlined_call_operand.vmem [shape: f32[8,128], index: 9, kind: output, shape index: {}]  }
   0x1   :  { %496 = vmatprep.subr.bf16.mxu0 %v589_v0  ;;  %v564_v1 = vld [vmem:[%s767_s1] sm:$0xff]   ;;  %498 = vmatprep.mubr.msk.bf16.mxu0 %vm590_vm0, %v589_v0  ;;  %v566_v4 = vld [vmem:[%s769_s3 + $0x8] sm:$0xff]   ;;  %v567_v5 = vld [vmem:[%s769_s3 + $0x10] sm:$0xff]  }
   0x2   :  { %v33_v2 = vld [vmem:[%s768_s0] sm:$0xf]  ;;  %502 = vmatprep.subr.bf16.mxu1 %v589_v0  ;;  %518 = vmatprep.mubr.msk.bf16.mxu1 %vm590_vm0, %v589_v0  ;;  %v568_v6 = vld [vmem:[%s769_s3 + $0x18] sm:$0xff]   ;;  %v570_v8 = vld [vmem:[%s769_s3 + $0x28] sm:$0xff]  }
   0x3   :  { %497 = vmatpush3.bf16.msra.mxu0 %v564_v1  ;;  %v565_v3 = vld [vmem:[%s769_s3] sm:$0xff]   ;;  %v571_v9 = vld [vmem:[%s769_s3 + $0x30] sm:$0xff]   ;;  %v572_v10 = vld [vmem:[%s769_s3 + $0x38] sm:$0xff]  }
   0x4   :  { %522 = vmatprep.subr.bf16.mxu0 %v589_v0  ;;  %503 = vmatpush3.bf16.msra.mxu1 %v565_v3  ;;  %v569_v7 = vld [vmem:[%s769_s3 + $0x20] sm:$0xff]   ;;  %v574_v12 = vld [vmem:[%s770_s5 + $0x8] sm:$0xff]   ;;  %v575_v13 = vld [vmem:[%s770_s5 + $0x10] sm:$0xff]  }
   0x5   :  { %504 = vmatprep.subr.bf16.mxu1 %v589_v0  ;;  %v573_v11 = vld [vmem:[%s770_s5] sm:$0xff]   ;;  %v576_v14 = vld [vmem:[%s770_s5 + $0x18] sm:$0xff]   ;;  %v578_v16 = vld [vmem:[%s770_s5 + $0x28] sm:$0xff]  }
   0x6   :  { %499 = vmatmul.mubr.msk.bf16.vlgmr.msra.gmra.mrb[0].mxu0 %vm49_vm1, %v33_v2  ;;  %v577_v15 = vld [vmem:[%s770_s5 + $0x20] sm:$0xff]   ;;  %v579_v25 = vld [vmem:[%s770_s5 + $0x30] sm:$0xff]   ;;  %v580_v26 = vld [vmem:[%s770_s5 + $0x38] sm:$0xff]  }
   0x7   :  { %538 = vmatprep.mubr.msk.bf16.mxu0 %vm590_vm0, %v589_v0  ;;  %523 = vmatpush3.bf16.msra.mxu0 %v573_v11  ;;  %v437_v17 = vld [vmem:[%s771_s2] ss:$0 sm:$0xff]  ;;  %v582_v28 = vld [vmem:[%s772_s7 + $0x8] sm:$0xff]   ;;  %v583_v29 = vld [vmem:[%s772_s7 + $0x10] sm:$0xff]  }
   0x8   :  { %505 = vmatpush3.bf16.msra.mxu1 %v566_v4  ;;  %524 = vmatprep.subr.bf16.mxu0 %v589_v0  ;;  %v581_v27 = vld [vmem:[%s772_s7] sm:$0xff]   ;;  %v584_v30 = vld [vmem:[%s772_s7 + $0x18] sm:$0xff]   ;;  %v586_v32 = vld [vmem:[%s772_s7 + $0x28] sm:$0xff]  }
   0x9   :  { %506 = vmatprep.subr.bf16.mxu1 %v589_v0  ;;  %v585_v31 = vld [vmem:[%s772_s7 + $0x20] sm:$0xff]   ;;  %v587_v41 = vld [vmem:[%s772_s7 + $0x30] sm:$0xff]   ;;  %v588_v42 = vld [vmem:[%s772_s7 + $0x38] sm:$0xff]  }
   0xa   :  { %v440_v33 = vld [vmem:[%s773_s4] ss:$0 sm:$0xff] }
   0xb   :  { %525 = vmatpush3.bf16.msra.mxu0 %v574_v12  ;;  %v449_v43 = vld [vmem:[%s774_s6] ss:$0 sm:$0xff] }
   0xc   :  { %507 = vmatpush3.bf16.msra.mxu1 %v567_v5  ;;  %526 = vmatprep.subr.bf16.mxu0 %v589_v0  ;;  %v458_v51 = vld [vmem:[%s775_s8] ss:$0 sm:$0xff] }
   0xd   :  { %508 = vmatprep.subr.bf16.mxu1 %v589_v0 }
   0xf   :  { %527 = vmatpush3.bf16.msra.mxu0 %v575_v13 }
  0x10   :  { %509 = vmatpush3.bf16.msra.mxu1 %v568_v6  ;;  %528 = vmatprep.subr.bf16.mxu0 %v589_v0 }
  0x11   :  { %510 = vmatprep.subr.bf16.mxu1 %v589_v0 }
  0x13   :  { %529 = vmatpush3.bf16.msra.mxu0 %v576_v14 }
  0x14   :  { %511 = vmatpush3.bf16.msra.mxu1 %v569_v7  ;;  %530 = vmatprep.subr.bf16.mxu0 %v589_v0 }
  0x15   :  { %512 = vmatprep.subr.bf16.mxu1 %v589_v0 }
  0x17   :  { %531 = vmatpush3.bf16.msra.mxu0 %v577_v15 }
  0x18   :  { %513 = vmatpush3.bf16.msra.mxu1 %v570_v8  ;;  %532 = vmatprep.subr.bf16.mxu0 %v589_v0 }
  0x19   :  { %514 = vmatprep.subr.bf16.mxu1 %v589_v0 }
  0x1b   :  { %533 = vmatpush3.bf16.msra.mxu0 %v578_v16 }
  0x1c   :  { %515 = vmatpush3.bf16.msra.mxu1 %v571_v9  ;;  %534 = vmatprep.subr.bf16.mxu0 %v589_v0 }
  0x1d   :  { %516 = vmatprep.subr.bf16.mxu1 %v589_v0 }
  0x1f   :  { %535 = vmatpush3.bf16.msra.mxu0 %v579_v25 }
  0x20   :  { %517 = vmatpush3.bf16.msra.mxu1 %v572_v10  ;;  %536 = vmatprep.subr.bf16.mxu0 %v589_v0 }
  0x21   :  { %542 = vmatprep.subr.bf16.mxu1 %v589_v0 }
  0x23   :  { %537 = vmatpush3.bf16.msra.mxu0 %v580_v26 }
  0xd9   :  { %v87_v18 = vpop.f32.mrb[0].mxu0 }
  0xda   :  { %v88_v19 = vadd.f32 %v437_v17, %v87_v18  ;;  %v500_v20 = vpop.f32.mrb[1].mxu0 }
  0xdb   :  { %v90_v21 = vpop.f32.mrb[2].mxu0 }
  0xdc   :  { %v93_v22 = vmax.f32 %v88_v19, 0.0  ;;  %v501_v23 = vpop.f32.mrb[3].mxu0 }
  0xde   :  { %v94_v24 = vpack.c.bf16 %v93_v22, %v93_v22 }
  0xe0   :  { %519 = vmatmul.mubr.bf16.vlgmr.msra.gmra.mrb[0].mxu1 %v94_v24 }
  0xe1   :  { %558 = vmatprep.mubr.msk.bf16.mxu1 %vm590_vm0, %v589_v0  ;;  %543 = vmatpush3.bf16.msra.mxu1 %v581_v27 }
  0xe2   :  { %544 = vmatprep.subr.bf16.mxu1 %v589_v0 }
  0xe5   :  { %545 = vmatpush3.bf16.msra.mxu1 %v582_v28 }
  0xe6   :  { %546 = vmatprep.subr.bf16.mxu1 %v589_v0 }
  0xe9   :  { %547 = vmatpush3.bf16.msra.mxu1 %v583_v29 }
  0xea   :  { %548 = vmatprep.subr.bf16.mxu1 %v589_v0 }
  0xed   :  { %549 = vmatpush3.bf16.msra.mxu1 %v584_v30 }
  0xee   :  { %550 = vmatprep.subr.bf16.mxu1 %v589_v0 }
  0xf1   :  { %551 = vmatpush3.bf16.msra.mxu1 %v585_v31 }
  0xf2   :  { %552 = vmatprep.subr.bf16.mxu1 %v589_v0 }
  0xf5   :  { %553 = vmatpush3.bf16.msra.mxu1 %v586_v32 }
  0xf6   :  { %554 = vmatprep.subr.bf16.mxu1 %v589_v0 }
  0xf9   :  { %555 = vmatpush3.bf16.msra.mxu1 %v587_v41 }
  0xfa   :  { %556 = vmatprep.subr.bf16.mxu1 %v589_v0 }
  0xfd   :  { %557 = vmatpush3.bf16.msra.mxu1 %v588_v42 }
 0x1b3   :  { %v200_v34 = vpop.f32.mrb[0].mxu1 }
 0x1b4   :  { %v201_v35 = vadd.f32 %v440_v33, %v200_v34  ;;  %v520_v36 = vpop.f32.mrb[1].mxu1 }
 0x1b5   :  { %v203_v37 = vpop.f32.mrb[2].mxu1 }
 0x1b6   :  { %v206_v38 = vmax.f32 %v201_v35, 0.0  ;;  %v521_v39 = vpop.f32.mrb[3].mxu1 }
 0x1b8   :  { %v207_v40 = vpack.c.bf16 %v206_v38, %v206_v38 }
 0x1ba   :  { %539 = vmatmul.mubr.bf16.vlgmr.msra.gmra.mrb[4].mxu0 %v207_v40 }
 0x28d   :  { %v313_v44 = vpop.f32.mrb[4].mxu0 }
 0x28e   :  { %v314_v45 = vadd.f32 %v449_v43, %v313_v44  ;;  %v540_v46 = vpop.f32.mrb[5].mxu0 }
 0x28f   :  { %v316_v47 = vpop.f32.mrb[6].mxu0 }
 0x290   :  { %v319_v48 = vmax.f32 %v314_v45, 0.0  ;;  %v541_v49 = vpop.f32.mrb[7].mxu0 }
 0x292   :  { %v320_v50 = vpack.c.bf16 %v319_v48, %v319_v48 }
 0x294   :  { %559 = vmatmul.mubr.bf16.vlgmr.msra.gmra.mrb[4].mxu1 %v320_v50 }
 0x367   :  { %v426_v52 = vpop.f32.mrb[4].mxu1 }
 0x368   :  { %v427_v53 = vadd.f32 %v458_v51, %v426_v52  ;;  %v560_v54 = vpop.f32.mrb[5].mxu1 }
 0x369   :  { %v429_v55 = vpop.f32.mrb[6].mxu1 }
 0x36a   :  { %432 = vst [vmem:[%s776_s9] sm:$0xff] %v427_v53  ;;  %v561_v56 = vpop.f32.mrb[7].mxu1 }

</bundles_post_ra>
